<compile_context>
chip_gen: v6e
topology: v6e:2x2x1
jax: 0.10.0
libtpu: 0.0.40
codegen_flags: <defaults>
</compile_context>

<pallas_src>
import jax
import jax.numpy as jnp
from jax.experimental import pallas as pl
from jax.experimental.pallas import tpu as pltpu


def _cdiv(a, b):
    return (a + b - 1) // b


def _round_up(n, m):
    return ((n + m - 1) // m) * m


def cls_kernel(x_ref, w1_ref, b1_ref, w2_ref, b2_ref, feat_ref, out_ref):
    # bottleneck: feat = x @ W1 + b1 (f32 accumulation on the MXU).
    # The f32 `feat` intermediate lives in a VMEM temp and feeds the second
    # matmul directly; only the (possibly downcast) copy is written to HBM
    # because the module returns it.
    x = x_ref[...]
    feat = jnp.dot(x, w1_ref[...], preferred_element_type=jnp.float32) + b1_ref[...]
    feat_ref[...] = feat.astype(feat_ref.dtype)
    # fc: out = feat @ W2 + b2 (full-precision feat as LHS).
    out = jnp.dot(feat, w2_ref[...], preferred_element_type=jnp.float32) + b2_ref[...]
    out_ref[...] = out.astype(out_ref.dtype)


def fused_out_kernel(x_ref, w_ref, b_ref, out_ref):
    # Single folded matmul: out = x @ (W1 @ W2) + (b1 @ W2 + b2).
    out = jnp.dot(x_ref[...], w_ref[...], preferred_element_type=jnp.float32) + b_ref[...]
    out_ref[...] = out.astype(out_ref.dtype)


def _batch_tiling(B, block_rows):
    """Pick (tm, padded_B, grid) with <=7 rows of padding waste and >=2 grid
    steps whenever B is large enough for both v7x TensorCores to matter."""
    num_tiles = _cdiv(B, block_rows)
    if num_tiles == 1 and B >= 16:
        num_tiles = 2
    tm = _round_up(_cdiv(B, num_tiles), 8)
    b_p = _round_up(B, tm)
    return tm, b_p, b_p // tm


def cls_forward(x, w1_t, b1, w2_t, b2, *, block_rows=1024, feat_dtype=None,
                return_feat=True, min_pallas_batch=256):
    """x: (B, in_dim); w1_t: (in_dim, bottleneck); b1: (1, bottleneck);
    w2_t: (bottleneck, out_dim); b2: (1, out_dim).

    return_feat=True  -> returns (feat, out), matching PyTorch CLS.forward.
    return_feat=False -> returns out only (folded-weight fast path, no feat
                         HBM writeback).
    feat_dtype        -> dtype of the returned feat (e.g. jnp.bfloat16 to
                         halve the dominant HBM write); accumulation for the
                         fc matmul stays f32 either way."""
    B, in_dim = x.shape
    bottleneck = w1_t.shape[1]
    out_dim = w2_t.shape[1]
    dtype = x.dtype
    feat_dtype = dtype if feat_dtype is None else feat_dtype
    itemsize = jnp.dtype(dtype).itemsize

    # Small-batch fast path: a single grid step is dominated by fixed launch /
    # per-step overhead; XLA's fused dot is faster at these sizes.
    if B < min_pallas_batch:
        feat_f32 = x.astype(jnp.float32) @ w1_t.astype(jnp.float32) + b1
        out = (feat_f32 @ w2_t.astype(jnp.float32) + b2).astype(dtype)
        if return_feat:
            return feat_f32.astype(feat_dtype), out
        return out

    tm, b_p, grid_n = _batch_tiling(B, block_rows)
    x_p = jnp.pad(x, ((0, b_p - B), (0, 0))) if b_p != B else x

    if not return_feat:
        # Fold the two layers: out = x @ (W1 @ W2) + (b1 @ W2 + b2).
        w_eff = (w1_t.astype(jnp.float32) @ w2_t.astype(jnp.float32)).astype(dtype)
        b_eff = (b1.astype(jnp.float32) @ w2_t.astype(jnp.float32)
                 + b2.astype(jnp.float32)).astype(dtype)
        flops = 2 * b_p * in_dim * out_dim
        bytes_accessed = itemsize * (b_p * in_dim + in_dim * out_dim + out_dim
                                     + b_p * out_dim)
        out_pad = pl.pallas_call(
            fused_out_kernel,
            out_shape=jax.ShapeDtypeStruct((b_p, out_dim), dtype),
            grid=(grid_n,),
            in_specs=[
                pl.BlockSpec((tm, in_dim), lambda i: (i, 0)),      # x: batch-tiled
                pl.BlockSpec((in_dim, out_dim), lambda i: (0, 0)),  # W_eff: resident
                pl.BlockSpec((1, out_dim), lambda i: (0, 0)),       # b_eff: resident
            ],
            out_specs=pl.BlockSpec((tm, out_dim), lambda i: (i, 0)),
            compiler_params=pltpu.CompilerParams(
                dimension_semantics=("parallel",)),
            cost_estimate=pl.CostEstimate(
                flops=flops, transcendentals=0, bytes_accessed=bytes_accessed),
        )(x_p, w_eff, b_eff)
        return out_pad[:B]

    flops = 2 * b_p * (in_dim * bottleneck + bottleneck * out_dim)
    bytes_accessed = (
        itemsize * (b_p * in_dim                               # x read
                    + in_dim * bottleneck + bottleneck          # W1, b1
                    + bottleneck * out_dim + out_dim            # W2, b2
                    + b_p * out_dim)                            # out write
        + jnp.dtype(feat_dtype).itemsize * b_p * bottleneck     # feat write
    )

    # Note: no vmem_limit_bytes override — per-step footprint (double-buffered
    # x/feat/out tiles + resident weights + f32 feat temp) is ~4-5 MiB at
    # tm=1024, comfortably under the scoped defaults on v5e/v6e/v7x.
    feat_pad, out_pad = pl.pallas_call(
        cls_kernel,
        out_shape=(
            jax.ShapeDtypeStruct((b_p, bottleneck), feat_dtype),
            jax.ShapeDtypeStruct((b_p, out_dim), dtype),
        ),
        grid=(grid_n,),
        in_specs=[
            pl.BlockSpec((tm, in_dim), lambda i: (i, 0)),          # x: batch-tiled
            pl.BlockSpec((in_dim, bottleneck), lambda i: (0, 0)),  # W1: resident
            pl.BlockSpec((1, bottleneck), lambda i: (0, 0)),       # b1: resident
            pl.BlockSpec((bottleneck, out_dim), lambda i: (0, 0)),  # W2: resident
            pl.BlockSpec((1, out_dim), lambda i: (0, 0)),          # b2: resident
        ],
        out_specs=(
            pl.BlockSpec((tm, bottleneck), lambda i: (i, 0)),      # feat
            pl.BlockSpec((tm, out_dim), lambda i: (i, 0)),         # out (unpadded)
        ),
        compiler_params=pltpu.CompilerParams(
            dimension_semantics=("parallel",)),
        cost_estimate=pl.CostEstimate(
            flops=flops, transcendentals=0, bytes_accessed=bytes_accessed),
    )(x_p, w1_t, b1, w2_t, b2)

    return feat_pad[:B], out_pad[:B]


if __name__ == "__main__":
    # Small shapes consistent with the module: in_dim=32, bottleneck=256, out_dim=16
    B, in_dim, bottleneck, out_dim = 8, 32, 256, 16

    key = jax.random.PRNGKey(0)
    k_x, k_w1, k_b1, k_w2, k_b2 = jax.random.split(key, 5)

    x = jax.random.normal(k_x, (B, in_dim), dtype=jnp.float32)
    # Deterministic synthetic params (nn.Linear-like scale), stored transposed.
    w1_t = jax.random.uniform(k_w1, (in_dim, bottleneck), dtype=jnp.float32,
                              minval=-1.0, maxval=1.0) / jnp.sqrt(in_dim)
    b1 = jax.random.uniform(k_b1, (1, bottleneck), dtype=jnp.float32,
                            minval=-1.0, maxval=1.0) / jnp.sqrt(in_dim)
    w2_t = jax.random.uniform(k_w2, (bottleneck, out_dim), dtype=jnp.float32,
                              minval=-1.0, maxval=1.0) / jnp.sqrt(bottleneck)
    b2 = jax.random.uniform(k_b2, (1, out_dim), dtype=jnp.float32,
                            minval=-1.0, maxval=1.0) / jnp.sqrt(bottleneck)

    # Force the Pallas path even at this tiny test batch (min_pallas_batch=0);
    # real callers with B < 256 get the jnp fast path by default.
    feat, out = cls_forward(x, w1_t, b1, w2_t, b2, min_pallas_batch=0)
    jax.block_until_ready((feat, out))

    # Pure-JAX reference check
    feat_ref = x @ w1_t + b1
    out_ref = feat_ref @ w2_t + b2
    assert feat.shape == (B, bottleneck) and out.shape == (B, out_dim)
    assert jnp.allclose(feat, feat_ref, atol=1e-5, rtol=1e-5)
    assert jnp.allclose(out, out_ref, atol=1e-5, rtol=1e-5)

    # Also exercise the folded no-feat Pallas path.
    out_only = cls_forward(x, w1_t, b1, w2_t, b2, return_feat=False,
                           min_pallas_batch=0)
    jax.block_until_ready(out_only)
    assert out_only.shape == (B, out_dim)
    assert jnp.allclose(out_only, out_ref, atol=1e-4, rtol=1e-4)

    print("KERNEL_OK")
</pallas_src>

<mosaic_0001>
module attributes {stable_mosaic.version = 11 : i64} {
  func.func @cls_kernel(%arg0: i32, %arg1: memref<8x32xf32, #tpu.memory_space<vmem>>, %arg2: memref<32x256xf32, #tpu.memory_space<vmem>>, %arg3: memref<1x256xf32, #tpu.memory_space<vmem>>, %arg4: memref<256x16xf32, #tpu.memory_space<vmem>>, %arg5: memref<1x16xf32, #tpu.memory_space<vmem>>, %arg6: memref<8x256xf32, #tpu.memory_space<vmem>>, %arg7: memref<8x16xf32, #tpu.memory_space<vmem>>) attributes {dimension_semantics = [#tpu.dimension_semantics<parallel>], iteration_bounds = array<i64: 1>, scalar_prefetch = 0 : i64, scratch_operands = 0 : i64, tpu.core_type = #tpu.core_type<tc>, window_params = [{transform_indices = @transform_0, window_bounds = array<i64: 8, 32>}, {pipeline_mode = #tpu.pipeline_mode<synchronous>, transform_indices = @transform_1, window_bounds = array<i64: 32, 256>}, {pipeline_mode = #tpu.pipeline_mode<synchronous>, transform_indices = @transform_2, window_bounds = array<i64: 1, 256>}, {pipeline_mode = #tpu.pipeline_mode<synchronous>, transform_indices = @transform_3, window_bounds = array<i64: 256, 16>}, {pipeline_mode = #tpu.pipeline_mode<synchronous>, transform_indices = @transform_4, window_bounds = array<i64: 1, 16>}, {transform_indices = @transform_5, window_bounds = array<i64: 8, 256>}, {transform_indices = @transform_6, window_bounds = array<i64: 8, 16>}]} {
    %c0 = arith.constant 0 : index
    %c0_0 = arith.constant 0 : index
    %0 = vector.load %arg1[%c0, %c0_0] : memref<8x32xf32, #tpu.memory_space<vmem>>, vector<8x32xf32>
    %c0_1 = arith.constant 0 : index
    %c0_2 = arith.constant 0 : index
    %1 = vector.load %arg2[%c0_1, %c0_2] : memref<32x256xf32, #tpu.memory_space<vmem>>, vector<32x256xf32>
    %cst = arith.constant dense<0.000000e+00> : vector<8x256xf32>
    %2 = tpu.matmul %0, %1, %cst {dimension_numbers = #tpu.dot_dimension_numbers<[1], [0], [0], [1], [0, 0, 1, 1], [], []>} : vector<8x32xf32>, vector<32x256xf32>, vector<8x256xf32> -> vector<8x256xf32>
    %c0_3 = arith.constant 0 : index
    %c0_4 = arith.constant 0 : index
    %3 = vector.load %arg3[%c0_3, %c0_4] : memref<1x256xf32, #tpu.memory_space<vmem>>, vector<1x256xf32>
    %4 = vector.broadcast %3 : vector<1x256xf32> to vector<8x256xf32>
    %5 = arith.addf %2, %4 : vector<8x256xf32>
    %c0_5 = arith.constant 0 : index
    %c0_6 = arith.constant 0 : index
    %6 = vector.load %arg6[%c0_5, %c0_6] : memref<8x256xf32, #tpu.memory_space<vmem>>, vector<8x256xf32>
    tpu.vector_store %arg6[%c0_5, %c0_6], %5 {strides = array<i32>} : memref<8x256xf32, #tpu.memory_space<vmem>>, vector<8x256xf32>,
    %c0_7 = arith.constant 0 : index
    %c0_8 = arith.constant 0 : index
    %7 = vector.load %arg4[%c0_7, %c0_8] : memref<256x16xf32, #tpu.memory_space<vmem>>, vector<256x16xf32>
    %cst_9 = arith.constant dense<0.000000e+00> : vector<8x16xf32>
    %8 = tpu.matmul %5, %7, %cst_9 {dimension_numbers = #tpu.dot_dimension_numbers<[1], [0], [0], [1], [0, 0, 1, 1], [], []>} : vector<8x256xf32>, vector<256x16xf32>, vector<8x16xf32> -> vector<8x16xf32>
    %c0_10 = arith.constant 0 : index
    %c0_11 = arith.constant 0 : index
    %9 = vector.load %arg5[%c0_10, %c0_11] : memref<1x16xf32, #tpu.memory_space<vmem>>, vector<1x16xf32>
    %10 = vector.broadcast %9 : vector<1x16xf32> to vector<8x16xf32>
    %11 = arith.addf %8, %10 : vector<8x16xf32>
    %c0_12 = arith.constant 0 : index
    %c0_13 = arith.constant 0 : index
    %12 = vector.load %arg7[%c0_12, %c0_13] : memref<8x16xf32, #tpu.memory_space<vmem>>, vector<8x16xf32>
    tpu.vector_store %arg7[%c0_12, %c0_13], %11 {strides = array<i32>} : memref<8x16xf32, #tpu.memory_space<vmem>>, vector<8x16xf32>,
    return
  }
  func.func @transform_0(%arg0: i32) -> (i32, i32) {
    %c0_i32 = arith.constant 0 : i32
    %c0_i32_0 = arith.constant 0 : i32
    return %arg0, %c0_i32 : i32, i32
  }
  func.func @transform_1(%arg0: i32) -> (i32, i32) {
    %c0_i32 = arith.constant 0 : i32
    %c0_i32_0 = arith.constant 0 : i32
    %c0_i32_1 = arith.constant 0 : i32
    return %c0_i32, %c0_i32_0 : i32, i32
  }
  func.func @transform_2(%arg0: i32) -> (i32, i32) {
    %c0_i32 = arith.constant 0 : i32
    %c0_i32_0 = arith.constant 0 : i32
    %c0_i32_1 = arith.constant 0 : i32
    return %c0_i32, %c0_i32_0 : i32, i32
  }
  func.func @transform_3(%arg0: i32) -> (i32, i32) {
    %c0_i32 = arith.constant 0 : i32
    %c0_i32_0 = arith.constant 0 : i32
    %c0_i32_1 = arith.constant 0 : i32
    return %c0_i32, %c0_i32_0 : i32, i32
  }
  func.func @transform_4(%arg0: i32) -> (i32, i32) {
    %c0_i32 = arith.constant 0 : i32
    %c0_i32_0 = arith.constant 0 : i32
    %c0_i32_1 = arith.constant 0 : i32
    return %c0_i32, %c0_i32_0 : i32, i32
  }
  func.func @transform_5(%arg0: i32) -> (i32, i32) {
    %c0_i32 = arith.constant 0 : i32
    %c0_i32_0 = arith.constant 0 : i32
    return %arg0, %c0_i32 : i32, i32
  }
  func.func @transform_6(%arg0: i32) -> (i32, i32) {
    %c0_i32 = arith.constant 0 : i32
    %c0_i32_0 = arith.constant 0 : i32
    return %arg0, %c0_i32 : i32, i32
  }
}

</mosaic_0001>

<bundles_post_ra>
// kernel: tpu_custom_call.1
= control target key start
LH: loop header
LB: loop body
LE: loop exit
PB: predicated region body
PF: predicated region fallthrough
CT: control target
= control target key end

     0   :  { %12 = vsyncpa [#allocation3], 0  ;;  %v345_v4 = vmov 0.0   ;;  %vm45_vm0 = vcmask 261120   ;;  %s518_s0 = inlined_call_operand.vmem [shape: f32[8,32], index: 0, kind: input, shape index: {}]   ;;  %s519_s1 = inlined_call_operand.vmem [shape: f32[32,256], index: 1, kind: input, shape index: {}]   ;;  %s520_s2 = inlined_call_operand.vmem [shape: f32[1,256], index: 2, kind: input, shape index: {}]   ;;  %s521_s3 = inlined_call_operand.vmem [shape: f32[256,16], index: 3, kind: input, shape index: {}]   ;;  %s522_s4 = inlined_call_operand.vmem [shape: f32[1,16], index: 4, kind: input, shape index: {}]   ;;  %s523_s5 = inlined_call_operand.hbm [shape: f32[8,256], index: 5, kind: output, shape index: {0}]   ;;  %s524_s6 = inlined_call_operand.hbm [shape: f32[8,16], index: 6, kind: output, shape index: {1}]  }
   0x1   :  { %v32_v0 = vld [vmem:[%s519_s1 + $0x38] sm:$0xff]  ;;  %v31_v1 = vld [vmem:[%s519_s1 + $0x30] sm:$0xff]  ;;  %v30_v2 = vld [vmem:[%s519_s1 + $0x28] sm:$0xff]  ;;  %113 = vmatprep.mubr.f32.mxu0 %v345_v4 }
   0x2   :  { %73 = vmatprep.subr.mxu0 %v32_v0  ;;  %v29_v3 = vld [vmem:[%s519_s1 + $0x20] sm:$0xff]  ;;  %v28_v5 = vld [vmem:[%s519_s1 + $0x18] sm:$0xff]  ;;  %v27_v6 = vld [vmem:[%s519_s1 + $0x10] sm:$0xff] }
   0x3   :  { %74 = vmatpush1.msra.mxu0 %v31_v1  ;;  %v153_v7 = vld [vmem:[%s521_s3 + $0xf8] sm:$0xff]  ;;  %v152_v9 = vld [vmem:[%s521_s3 + $0xf0] sm:$0xff]  ;;  %v26_v10 = vld [vmem:[%s519_s1 + $0x8] sm:$0xff] }
   0x4   :  { %75 = vmatprep.subr.mxu0 %v30_v2  ;;  %v137_v8 = vld [vmem:[%s521_s3 + $0x78] sm:$0xff]  ;;  %263 = vmatprep.subr.mxu1 %v153_v7  ;;  %v136_v11 = vld [vmem:[%s521_s3 + $0x70] sm:$0xff]  ;;  %v25_v12 = vld [vmem:[%s519_s1] sm:$0xff] }
   0x5   :  { %76 = vmatpush1.msra.mxu0 %v29_v3  ;;  %264 = vmatpush3.msra.mxu1 %v137_v8  ;;  %v151_v13 = vld [vmem:[%s521_s3 + $0xe8] sm:$0xff]  ;;  %v24_v14 = vld [vmem:[%s518_s0] sm:$0xff]  ;;  %v149_v18 = vld [vmem:[%s521_s3 + $0xd8] sm:$0xff] }
   0x6   :  { %77 = vmatprep.subr.mxu0 %v28_v5  ;;  %265 = vmatprep.subr.mxu1 %v152_v9  ;;  %v135_v15 = vld [vmem:[%s521_s3 + $0x68] sm:$0xff]  ;;  %v150_v16 = vld [vmem:[%s521_s3 + $0xe0] sm:$0xff]  ;;  %v133_v19 = vld [vmem:[%s521_s3 + $0x58] sm:$0xff] }
   0x7   :  { %78 = vmatpush1.msra.mxu0 %v27_v6  ;;  %266 = vmatpush3.msra.mxu1 %v136_v11  ;;  %v134_v17 = vld [vmem:[%s521_s3 + $0x60] sm:$0xff]  ;;  %v148_v20 = vld [vmem:[%s521_s3 + $0xd0] sm:$0xff] }
   0x8   :  { %79 = vmatprep.subr.mxu0 %v26_v10  ;;  %267 = vmatprep.subr.mxu1 %v151_v13  ;;  %v132_v21 = vld [vmem:[%s521_s3 + $0x50] sm:$0xff] }
   0x9   :  { %80 = vmatpush1.msra.mxu0 %v25_v12  ;;  %268 = vmatpush3.msra.mxu1 %v135_v15 }
   0xa   :  { %261 = vmatmul.mubr.msk.f32.vlgmr.msra.gmra.mxu0 %vm45_vm0, %v24_v14  ;;  %269 = vmatprep.subr.mxu1 %v150_v16 }
   0xb   :  { %270 = vmatpush3.msra.mxu1 %v134_v17 }
   0xc   :  { %271 = vmatprep.subr.mxu1 %v149_v18 }
   0xd   :  { %13 = vsyncpa [#allocation5], 0  ;;  %272 = vmatpush3.msra.mxu1 %v133_v19  ;;  %v147_v22 = vld [vmem:[%s521_s3 + $0xc8] sm:$0xff]  ;;  %v146_v24 = vld [vmem:[%s521_s3 + $0xc0] sm:$0xff]  ;;  %v35_v42 = vlaneseq }
   0xe   :  { %273 = vmatprep.subr.mxu1 %v148_v20  ;;  %v131_v23 = vld [vmem:[%s521_s3 + $0x48] sm:$0xff]  ;;  %v130_v25 = vld [vmem:[%s521_s3 + $0x40] sm:$0xff]  ;;  %v145_v26 = vld [vmem:[%s521_s3 + $0xb8] sm:$0xff] }
   0xf   :  { %274 = vmatpush3.msra.mxu1 %v132_v21  ;;  %v129_v27 = vld [vmem:[%s521_s3 + $0x38] sm:$0xff]  ;;  %v144_v28 = vld [vmem:[%s521_s3 + $0xb0] sm:$0xff]  ;;  %v143_v30 = vld [vmem:[%s521_s3 + $0xa8] sm:$0xff]  ;;  %v36_v43 = vshrl.u32 %v35_v42, 7 }
  0x10   :  { %275 = vmatprep.subr.mxu1 %v147_v22  ;;  %v128_v29 = vld [vmem:[%s521_s3 + $0x30] sm:$0xff]  ;;  %v127_v31 = vld [vmem:[%s521_s3 + $0x28] sm:$0xff]  ;;  %v142_v32 = vld [vmem:[%s521_s3 + $0xa0] sm:$0xff] }
  0x11   :  { %276 = vmatpush3.msra.mxu1 %v131_v23  ;;  %v126_v33 = vld [vmem:[%s521_s3 + $0x20] sm:$0xff]  ;;  %v141_v34 = vld [vmem:[%s521_s3 + $0x98] sm:$0xff]  ;;  %v140_v36 = vld [vmem:[%s521_s3 + $0x90] sm:$0xff]  ;;  %v37_v44 = vsub.s32 0, %v36_v43  ;;  %v41_v46 = vsub.s32 1, %v36_v43 }
  0x12   :  { %277 = vmatprep.subr.mxu1 %v146_v24  ;;  %v125_v35 = vld [vmem:[%s521_s3 + $0x18] sm:$0xff]  ;;  %v124_v37 = vld [vmem:[%s521_s3 + $0x10] sm:$0xff]  ;;  %v139_v38 = vld [vmem:[%s521_s3 + $0x88] sm:$0xff] }
  0x13   :  { %278 = vmatpush3.msra.mxu1 %v130_v25  ;;  %v123_v39 = vld [vmem:[%s521_s3 + $0x8] sm:$0xff]  ;;  %v138_v40 = vld [vmem:[%s521_s3 + $0x80] sm:$0xff] }
  0x14   :  { %279 = vmatprep.subr.mxu1 %v145_v26  ;;  %v122_v41 = vld [vmem:[%s521_s3] sm:$0xff]  ;;  %s346_s3 = smov [#allocation2]  }
  0x15   :  { %280 = vmatpush3.msra.mxu1 %v129_v27  ;;  %v33_v45 = vld [vmem:[%s520_s2] sm:$0x3]  ;;  %s239_s28 = sshll.u32 %s346_s3, 4  ;;  %s240_s28 = int_to_ptr.vmem [resolvable:$true] %s239_s28 }
  0x16   :  { %281 = vmatprep.subr.mxu1 %v144_v28  ;;  %v38_v47 = vrot.slane %v33_v45, %v37_v44  ;;  %v42_v48 = vrot.slane %v33_v45, %v41_v46  ;;  %s301_s29 = scalar_lea.vmem %s240_s28, 256  ;;  %p306_p1 = scmp.lt.s32.totalorder %s240_s28, %s240_s28 }
  0x17   :  { %282 = vmatpush3.msra.mxu1 %v128_v29  ;;  %p302_p0 = scmp.ne.s32.totalorder %s240_s28, %s301_s29  ;;  %p307_p2 = scmp.lt.s32.totalorder %s301_s29, %s301_s29 }
  0x18   :  { %283 = vmatprep.subr.mxu1 %v143_v30 }
  0x19   :  { %284 = vmatpush3.msra.mxu1 %v127_v31  ;;  %p308_p3 = por %p307_p2, %p306_p1 }
  0x1a   :  { %285 = vmatprep.subr.mxu1 %v142_v32 }
  0x1b   :  { %286 = vmatpush3.msra.mxu1 %v126_v33  ;;  %p309_p4 = pnand %p308_p3, %p302_p0 }
  0x1c   :  { %287 = vmatprep.subr.mxu1 %v141_v34 }
  0x1d   :  { %288 = vmatpush3.msra.mxu1 %v125_v35 }
  0x1e   :  { %289 = vmatprep.subr.mxu1 %v140_v36 }
  0x1f   :  { %290 = vmatpush3.msra.mxu1 %v124_v37 }
  0x20   :  { %291 = vmatprep.subr.mxu1 %v139_v38 }
  0x21   :  { %292 = vmatpush3.msra.mxu1 %v123_v39 }
  0x22   :  { %293 = vmatprep.subr.mxu1 %v138_v40 }
  0x23   :  { %294 = vmatpush3.msra.mxu1 %v122_v41 }
  0xca   :  { %v115_v49 = vpop.f32.mrf.mxu0 }
  0xcb   :  { %v116_v50 = vadd.f32 %v115_v49, %v38_v47 }
  0xcc   :  { %v117_v51 = vpop.f32.mrf.mxu0 }
  0xcd   :  { %120 = vst [vmem:[#allocation2] sm:$0xff] %v116_v50  ;;  %v118_v52 = vadd.f32 %v117_v51, %v42_v48 }
  0xcf   :  { %121 = vst [vmem:[#allocation2 + $0x8] sm:$0xff] %v118_v52  ;;  %225 = vmatprep.mubr.f32.mxu1 %v118_v52 }
  0xd0   :  { %226 = vmatmul.mubr.f32.vlgmr.msra.gmra.mxu1 %v116_v50 }
  0xd1   :  { %312 = shalt.err (!%p309_p4)
}
  0xd2   :  { %242 = dma.vmem_to_hbm [thread:$0]  %s240_s28, 256, %s523_s5, [#allocation3]   ;;  %v262_v54 = vld [vmem:[%s522_s4] ss:$0 sm:$0xff]  ;;  %vm231_vm1 = vcmask 130048  }
  0xd3   :  { %s347_s8 = smov [#allocation4]  }
  0xd4   :  { %s249_s9 = sshll.u32 %s347_s8, 4  ;;  %s250_s9 = int_to_ptr.vmem [resolvable:$true] %s249_s9 }
  0xd5   :  { %s321_s10 = scalar_lea.vmem %s250_s9, 128  ;;  %p326_p6 = scmp.lt.s32.totalorder %s250_s9, %s250_s9 }
  0xd6   :  { %p322_p5 = scmp.ne.s32.totalorder %s250_s9, %s321_s10  ;;  %p327_p7 = scmp.lt.s32.totalorder %s321_s10, %s321_s10 }
  0xd8   :  { %p328_p8 = por %p327_p7, %p326_p6 }
  0xda   :  { %p329_p9 = pnand %p328_p8, %p322_p5 }
 0x190   :  { %v295_v53 = vpop.f32.mrf.mxu1 }
 0x192   :  { %v296_v55 = vpop.f32.mrf.mxu1 }
 0x193   :  { %v297_v56 = vadd.f32 %v296_v55, %v295_v53 }
 0x195   :  { %v228_v57 = vadd.f32 %v297_v56, %v262_v54 }
 0x197   :  { %232 = vst.msk [vmem:[#allocation4] sm:$0xff] %vm231_vm1, %v228_v57 }
 0x198   :  { %332 = shalt.err (!%p329_p9)
}
 0x199   :  { %252 = dma.vmem_to_hbm [thread:$0]  %s250_s9, 128, %s524_s6, [#allocation5]  }
 0x19a   :  { %341 = dma.done.wait [#allocation3], 256  }
 0x19b   :  { %342 = vsyncadd [#allocation3], 4294967040 }
 0x19c   :  { %343 = dma.done.wait [#allocation5], 128  }
 0x19d   :  { %344 = vsyncadd [#allocation5], 4294967168 }
 0x19e   :  { %259 = vsyncpa [#allocation3], 1 }
 0x19f   :  { %260 = vsyncpa [#allocation5], 1 }

</bundles_post_ra>
